<compile_context>
chip_gen: v5e
topology: v5e:2x2
jax: 0.10.0
libtpu: 0.0.40
codegen_flags: <defaults>
</compile_context>

<pallas_src>
import jax
import jax.numpy as jnp
from jax.experimental import pallas as pl
from jax.experimental.pallas import tpu as pltpu


def _dma_copy_kernel(x_ref, o_ref, sem):
    # One HBM->HBM DMA: no VMEM staging, no grid, no layout constraints.
    cp = pltpu.make_async_copy(x_ref, o_ref, sem)
    cp.start()
    cp.wait()


def _pallas_copy(x):
    """Materialize a copy of `x` with a single whole-tensor DMA."""
    nbytes = x.size * jnp.dtype(x.dtype).itemsize
    return pl.pallas_call(
        _dma_copy_kernel,
        out_shape=jax.ShapeDtypeStruct(x.shape, x.dtype),
        in_specs=[pl.BlockSpec(memory_space=pl.ANY)],    # stay in HBM, raw ref
        out_specs=pl.BlockSpec(memory_space=pl.ANY),     # stay in HBM, raw ref
        scratch_shapes=[pltpu.SemaphoreType.DMA(())],
        cost_estimate=pl.CostEstimate(
            flops=0, transcendentals=0, bytes_accessed=2 * nbytes),
    )(x)


def index_forward(tensors, index=0, copy=False):
    """Pallas implementation of ultralytics `Index`: returns tensors[index].

    Default (copy=False) matches the PyTorch module exactly: a static,
    host-side list selection with zero device traffic.  Set copy=True to
    force a materialized device copy via a single HBM->HBM DMA kernel.
    """
    # TODO(synk): sub-byte packed dtypes (int4/fp4/bool) are untested on the
    # copy=True DMA path; the default no-copy path handles them trivially.
    x = tensors[index]                  # the actual "Index" op (static)
    if not copy:
        return x
    return _pallas_copy(x)


if __name__ == "__main__":
    key = jax.random.PRNGKey(0)
    k0, k1, k2 = jax.random.split(key, 3)

    # A small multi-scale feature list, as Index would see inside a YOLO graph.
    tensors = [
        jax.random.normal(k0, (2, 4, 16, 16), dtype=jnp.float32),
        jax.random.normal(k1, (2, 8, 8, 8), dtype=jnp.float32),
        jax.random.normal(k2, (2, 16, 4, 4), dtype=jnp.float32),
    ]

    ok = True
    for idx in range(len(tensors)):
        ref = tensors[idx]

        # Default path: pure static selection (module semantics, no copy).
        out_fast = index_forward(tensors, index=idx)
        ok &= out_fast.shape == ref.shape
        ok &= bool(jnp.array_equal(out_fast, ref))

        # Explicit-copy path: exercises the Pallas HBM->HBM DMA kernel.
        out_copy = jax.block_until_ready(index_forward(tensors, index=idx, copy=True))
        ok &= out_copy.shape == ref.shape
        ok &= out_copy.dtype == ref.dtype
        ok &= bool(jnp.array_equal(out_copy, ref))

    assert ok, "mismatch vs reference list indexing"
    print("KERNEL_OK")
</pallas_src>

<mosaic_0001>
module attributes {stable_mosaic.version = 11 : i64} {
  func.func @_dma_copy_kernel(%arg0: memref<2x4x16x16xf32, #tpu.memory_space<any>>, %arg1: memref<2x4x16x16xf32, #tpu.memory_space<any>>, %arg2: memref<!tpu.dma_semaphore, #tpu.memory_space<semaphore_mem>>) attributes {dimension_semantics = [], scalar_prefetch = 0 : i64, scratch_operands = 1 : i64, tpu.core_type = #tpu.core_type<tc>} {
    tpu.enqueue_dma source(%arg0 : memref<2x4x16x16xf32, #tpu.memory_space<any>>) target(%arg1 : memref<2x4x16x16xf32, #tpu.memory_space<any>>) target_semaphore(%arg2 : memref<!tpu.dma_semaphore, #tpu.memory_space<semaphore_mem>>)
    tpu.wait_dma2 semaphore(%arg2 : memref<!tpu.dma_semaphore, #tpu.memory_space<semaphore_mem>>) src(%arg0 : memref<2x4x16x16xf32, #tpu.memory_space<any>>) dst(%arg1 : memref<2x4x16x16xf32, #tpu.memory_space<any>>)
    return
  }
}

</mosaic_0001>

<bundles_post_ra>
// kernel: tpu_custom_call.1
= control target key start
LH: loop header
LB: loop body
LE: loop exit
PB: predicated region body
PF: predicated region fallthrough
CT: control target
= control target key end

     0   :  { %s34_s12 = smov [#allocation2]   ;;  %s35_s13 = smov [#allocation3]   ;;  %s53_s0 = inlined_call_operand.hbm [shape: f32[2,4,16,16], index: 0, kind: input, shape index: {}]   ;;  %s54_s1 = inlined_call_operand.hbm [shape: f32[2,4,16,16], index: 1, kind: output, shape index: {}]  }
   0x1   :  { %s10_s8 = sshll.u32 %s53_s0, 4  ;;  %s12_s11 = sshll.u32 %s54_s1, 4  ;;  %s11_s8 = int_to_ptr.hbm [resolvable:$true] %s10_s8  ;;  %s13_s11 = int_to_ptr.hbm [resolvable:$true] %s12_s11 }
   0x2   :  { %s36_s14 = smov 0  }
   0x3   :  { %16 = dma.general %s11_s8, 2048, %s13_s11, %s34_s12, %s35_s13, [#allocation4], %s36_s14, 0  }
   0x4   :  { %32 = dma.done.wait [#allocation2], 2048 }
   0x5   :  { %33 = vsyncadd [#allocation2], 4294965248 }
   0x6   :  { %22 = vsyncmov [#allocation2] }
   0x9   :  { %s23_s15 = vpop.sfrf %22 }
   0xa   :  { %p28_p0 = scmp.ne.s32.totalorder %s23_s15, 0 }
   0xc   :  { %27 = shalt.err (%p28_p0)  }

</bundles_post_ra>
